<compile_context>
chip_gen: v7x
topology: tpu7x:2x2x1
jax: 0.10.0
libtpu: 0.0.40
codegen_flags: <defaults>
</compile_context>

<pallas_src>
from functools import partial

import jax
import jax.numpy as jnp
import numpy as np
from jax.experimental import pallas as pl
from jax.experimental.pallas import tpu as pltpu


def conv_block_kernel(x_ref, w1_ref, w2_ref, b1_ref, b2_ref, g_ref, bt_ref,
                      masks_ref, alpha_ref, out_ref,
                      *, Cin, H, W, K, pad, dil, pad_rows, eps):
    """Fused ConvBlock, one grid step per batch image.

    x_ref       : (1, Cin, H*W)        this image, channel-major (free reshape)
    w1_ref      : (Cin,  KKCp)         conv_dep weight, cols [kh, kw, ci] + zero pad
    w2_ref      : (Cout, KKCp)         conv_point weight, same layout
    b1_ref      : (Cin, 1)             conv_dep bias
    b2_ref      : (Cout, 1)            conv_point bias
    g_ref/bt_ref: (Cout, 1)            LayerNorm weight / bias
    masks_ref   : (K*K, H*W)           0/1 boundary mask per kernel tap (per image)
    alpha_ref   : (1,)  [SMEM]         PReLU slope
    out_ref     : (1, Cout, H*W)       output block (lane-dense: last dim = H*W)
    """
    f32 = jnp.float32
    HW = H * W
    KK = K * K

    # Combined lane shift per tap.  roll is circular; every wrapped or
    # out-of-image element is killed by the 0/1 tap mask, so no zero-padded
    # scratch image is needed.  (Invariant: masks only multiply by 0/finite.)
    offs = [(kh * dil - pad, kw * dil - pad) for kh in range(K) for kw in range(K)]
    shifts = [(-(dh * W + dw)) % HW for (dh, dw) in offs]

    # Hoist the tap-mask loads + broadcasts once; reused by BOTH conv passes.
    # The centre tap (shift == 0) is all-ones -> no mask, no roll.
    bmask = {t: jnp.broadcast_to(masks_ref[t:t + 1, :], (Cin, HW))
             for t, s in enumerate(shifts) if s != 0}

    zpad = jnp.zeros((pad_rows, HW), f32) if pad_rows else None

    def im2col(v):
        # v: (Cin, HW) value  ->  (KK*Cin + pad_rows, HW) in-register patch matrix
        blocks = []
        for t, s in enumerate(shifts):
            if s == 0:
                blocks.append(v)                                   # centre tap
            else:
                blocks.append(pltpu.roll(v, s, axis=1) * bmask[t])  # XLU + VPU
        if zpad is not None:
            blocks.append(zpad)                                    # pad 36 -> 40
        return jnp.concatenate(blocks, axis=0)

    x = x_ref[0, :, :].astype(f32)                                 # (Cin, HW)

    # ---------------- conv_dep: dense Cin -> Cin (groups=1), one MXU matmul ----
    h1 = jnp.dot(w1_ref[...], im2col(x), preferred_element_type=f32) + b1_ref[...]

    # ---------------- conv_point: Cin -> Cout, one MXU matmul -------------------
    h2 = jnp.dot(w2_ref[...], im2col(h1), preferred_element_type=f32) + b2_ref[...]

    # ---------------- LayerNorm over the channel (sublane) axis -----------------
    mean = jnp.mean(h2, axis=0, keepdims=True)                     # (1, HW)
    var = jnp.mean((h2 - mean) ** 2, axis=0, keepdims=True)
    hn = (h2 - mean) * jax.lax.rsqrt(var + eps)
    hn = hn * g_ref[...] + bt_ref[...]

    # ---------------- PReLU (single shared slope, from SMEM) --------------------
    a = alpha_ref[0]
    y = jnp.where(hn >= 0, hn, a * hn)                             # (Cout, HW)

    # lane-dense (256-wide) unmasked output store
    out_ref[0, :, :] = y.astype(out_ref.dtype)


def _tap_masks(H, W, K, pad, dil):
    """0/1 float mask per kernel tap over one image's flattened H*W lane axis."""
    # TODO(synk): at large H*W generate these in-kernel from broadcasted_iota
    # instead of shipping them from HBM.
    i = np.arange(H * W) // W
    j = np.arange(H * W) % W
    rows = []
    for kh in range(K):
        for kw in range(K):
            dh, dw = kh * dil - pad, kw * dil - pad
            ok = ((i + dh >= 0) & (i + dh < H) & (j + dw >= 0) & (j + dw < W))
            rows.append(ok.astype(np.float32))
    return np.stack(rows, axis=0)                                  # (K*K, H*W)


@partial(jax.jit, static_argnames=("K", "pad", "dil", "eps"))
def conv_block_forward(x_nchw, wd, bd, wp, bp, gamma, beta, alpha,
                       *, K, pad, dil, eps=1e-5):
    """x_nchw (B,Cin,H,W) f32, conv weights in PyTorch OIHW -> (B,Cout,H,W) f32."""
    B, Cin, H, W = x_nchw.shape
    Cout = wp.shape[0]
    if 2 * pad != dil * (K - 1):
        # TODO(synk): general output geometry; the module instance here is 'same'.
        raise NotImplementedError("kernel assumes 2*pad == dilation*(kernel_size-1)")

    HW = H * W
    KK = K * K
    KKC = KK * Cin
    KKCp = ((KKC + 7) // 8) * 8                 # sublane-aligned contraction dim
    pad_rows = KKCp - KKC

    # zero-cost reshape (no transpose, no pad): NCHW -> (B, Cin, H*W)
    x3 = x_nchw.astype(jnp.float32).reshape(B, Cin, HW)

    # tiny one-time parameter re-layout: OIHW -> (O, [kh, kw, ci]) + zero columns
    w1 = jnp.transpose(wd, (0, 2, 3, 1)).reshape(Cin, KKC).astype(jnp.float32)
    w2 = jnp.transpose(wp, (0, 2, 3, 1)).reshape(Cout, KKC).astype(jnp.float32)
    if pad_rows:
        w1 = jnp.concatenate([w1, jnp.zeros((Cin, pad_rows), jnp.float32)], axis=1)
        w2 = jnp.concatenate([w2, jnp.zeros((Cout, pad_rows), jnp.float32)], axis=1)
    b1 = bd.reshape(Cin, 1).astype(jnp.float32)
    b2 = bp.reshape(Cout, 1).astype(jnp.float32)
    g = gamma.reshape(Cout, 1).astype(jnp.float32)
    bt = beta.reshape(Cout, 1).astype(jnp.float32)
    a = jnp.asarray(alpha, jnp.float32).reshape(1)
    masks = jnp.asarray(_tap_masks(H, W, K, pad, dil))             # (KK, HW)

    kernel = partial(conv_block_kernel, Cin=Cin, H=H, W=W, K=K, pad=pad,
                     dil=dil, pad_rows=pad_rows, eps=eps)

    out = pl.pallas_call(
        kernel,
        out_shape=jax.ShapeDtypeStruct((B, Cout, HW), jnp.float32),
        grid=(B,),                                      # one image per grid step
        in_specs=[
            pl.BlockSpec((1, Cin, HW), lambda b: (b, 0, 0)),         # x (per image)
            pl.BlockSpec((Cin, KKCp), lambda b: (0, 0)),             # conv_dep weight
            pl.BlockSpec((Cout, KKCp), lambda b: (0, 0)),            # conv_point weight
            pl.BlockSpec((Cin, 1), lambda b: (0, 0)),                # conv_dep bias
            pl.BlockSpec((Cout, 1), lambda b: (0, 0)),               # conv_point bias
            pl.BlockSpec((Cout, 1), lambda b: (0, 0)),               # LN gamma
            pl.BlockSpec((Cout, 1), lambda b: (0, 0)),               # LN beta
            pl.BlockSpec((KK, HW), lambda b: (0, 0)),                # tap masks
            pl.BlockSpec(memory_space=pltpu.MemorySpace.SMEM),       # PReLU slope
        ],
        out_specs=pl.BlockSpec((1, Cout, HW), lambda b: (b, 0, 0)),
        compiler_params=pltpu.CompilerParams(
            # independent per-image steps: shard across the two TCs on v7x,
            # harmless single-TC loop on v5e / v6e.
            dimension_semantics=("parallel",),
        ),
    )(x3, w1, w2, b1, b2, g, bt, masks, a)

    return out.reshape(B, Cout, H, W)


def conv_block_reference(x, wd, bd, wp, bp, gamma, beta, alpha, *, pad, dil, eps=1e-5):
    """Pure-JAX reference matching the PyTorch module semantics (NCHW / OIHW)."""
    dn = ('NCHW', 'OIHW', 'NCHW')
    h1 = jax.lax.conv_general_dilated(
        x, wd, window_strides=(1, 1), padding=[(pad, pad), (pad, pad)],
        rhs_dilation=(dil, dil), dimension_numbers=dn) + bd[None, :, None, None]
    h2 = jax.lax.conv_general_dilated(
        h1, wp, window_strides=(1, 1), padding=[(pad, pad), (pad, pad)],
        rhs_dilation=(dil, dil), dimension_numbers=dn) + bp[None, :, None, None]
    mean = h2.mean(axis=1, keepdims=True)
    var = ((h2 - mean) ** 2).mean(axis=1, keepdims=True)
    hn = (h2 - mean) / jnp.sqrt(var + eps)
    hn = hn * gamma[None, :, None, None] + beta[None, :, None, None]
    return jnp.where(hn >= 0, hn, alpha * hn)


if __name__ == "__main__":
    # ConvBlock(in_channels=4, out_channels=8, kernel_size=3, padding=2, dilation=2)
    B, Cin, Cout, H, W = 2, 4, 8, 16, 16
    K, pad, dil = 3, 2, 2

    key = jax.random.PRNGKey(0)
    k_x, k_wd, k_bd, k_wp, k_bp, k_g, k_b = jax.random.split(key, 7)

    x = jax.random.normal(k_x, (B, Cin, H, W), jnp.float32)

    # deterministic synthetic parameters in PyTorch layouts (OIHW weights)
    wd = jax.random.normal(k_wd, (Cin, Cin, K, K), jnp.float32) * 0.1
    bd = jax.random.normal(k_bd, (Cin,), jnp.float32) * 0.1
    wp = jax.random.normal(k_wp, (Cout, Cin, K, K), jnp.float32) * 0.1
    bp = jax.random.normal(k_bp, (Cout,), jnp.float32) * 0.1
    gamma = 1.0 + 0.1 * jax.random.normal(k_g, (Cout,), jnp.float32)
    beta = 0.1 * jax.random.normal(k_b, (Cout,), jnp.float32)
    alpha = jnp.float32(0.25)                           # PReLU default init

    out = conv_block_forward(x, wd, bd, wp, bp, gamma, beta, alpha,
                             K=K, pad=pad, dil=dil)
    out = jax.block_until_ready(out)

    ref = conv_block_reference(x, wd, bd, wp, bp, gamma, beta, alpha,
                               pad=pad, dil=dil)
    np.testing.assert_allclose(np.asarray(out), np.asarray(ref),
                               rtol=1e-4, atol=1e-4)

    print("KERNEL_OK")
</pallas_src>

<mosaic_0001>
module attributes {stable_mosaic.version = 11 : i64} {
  func.func @conv_block_kernel(%arg0: i32, %arg1: memref<1x4x256xf32, #tpu.memory_space<vmem>>, %arg2: memref<4x40xf32, #tpu.memory_space<vmem>>, %arg3: memref<8x40xf32, #tpu.memory_space<vmem>>, %arg4: memref<4x1xf32, #tpu.memory_space<vmem>>, %arg5: memref<8x1xf32, #tpu.memory_space<vmem>>, %arg6: memref<8x1xf32, #tpu.memory_space<vmem>>, %arg7: memref<8x1xf32, #tpu.memory_space<vmem>>, %arg8: memref<9x256xf32, #tpu.memory_space<vmem>>, %arg9: memref<1xf32, #tpu.memory_space<smem>>, %arg10: memref<1x8x256xf32, #tpu.memory_space<vmem>>) attributes {dimension_semantics = [#tpu.dimension_semantics<parallel>], iteration_bounds = array<i64: 2>, scalar_prefetch = 0 : i64, scratch_operands = 0 : i64, tpu.core_type = #tpu.core_type<tc>, window_params = [{transform_indices = @transform_0, window_bounds = array<i64: 1, 4, 256>}, {pipeline_mode = #tpu.pipeline_mode<synchronous>, transform_indices = @transform_1, window_bounds = array<i64: 4, 40>}, {pipeline_mode = #tpu.pipeline_mode<synchronous>, transform_indices = @transform_2, window_bounds = array<i64: 8, 40>}, {pipeline_mode = #tpu.pipeline_mode<synchronous>, transform_indices = @transform_3, window_bounds = array<i64: 4, 1>}, {pipeline_mode = #tpu.pipeline_mode<synchronous>, transform_indices = @transform_4, window_bounds = array<i64: 8, 1>}, {pipeline_mode = #tpu.pipeline_mode<synchronous>, transform_indices = @transform_5, window_bounds = array<i64: 8, 1>}, {pipeline_mode = #tpu.pipeline_mode<synchronous>, transform_indices = @transform_6, window_bounds = array<i64: 8, 1>}, {pipeline_mode = #tpu.pipeline_mode<synchronous>, transform_indices = @transform_7, window_bounds = array<i64: 9, 256>}, {transform_indices = @transform_8, window_bounds = array<i64: 1>}, {transform_indices = @transform_9, window_bounds = array<i64: 1, 8, 256>}]} {
    %c0 = arith.constant 0 : index
    %c0_0 = arith.constant 0 : index
    %0 = vector.load %arg8[%c0, %c0_0] : memref<9x256xf32, #tpu.memory_space<vmem>>, vector<1x256xf32>
    %1 = vector.shape_cast %0 : vector<1x256xf32> to vector<1x256xf32>
    %2 = vector.broadcast %1 : vector<1x256xf32> to vector<4x256xf32>
    %c1 = arith.constant 1 : index
    %c0_1 = arith.constant 0 : index
    %3 = vector.load %arg8[%c1, %c0_1] : memref<9x256xf32, #tpu.memory_space<vmem>>, vector<1x256xf32>
    %4 = vector.shape_cast %3 : vector<1x256xf32> to vector<1x256xf32>
    %5 = vector.broadcast %4 : vector<1x256xf32> to vector<4x256xf32>
    %c2 = arith.constant 2 : index
    %c0_2 = arith.constant 0 : index
    %6 = vector.load %arg8[%c2, %c0_2] : memref<9x256xf32, #tpu.memory_space<vmem>>, vector<1x256xf32>
    %7 = vector.shape_cast %6 : vector<1x256xf32> to vector<1x256xf32>
    %8 = vector.broadcast %7 : vector<1x256xf32> to vector<4x256xf32>
    %c3 = arith.constant 3 : index
    %c0_3 = arith.constant 0 : index
    %9 = vector.load %arg8[%c3, %c0_3] : memref<9x256xf32, #tpu.memory_space<vmem>>, vector<1x256xf32>
    %10 = vector.shape_cast %9 : vector<1x256xf32> to vector<1x256xf32>
    %11 = vector.broadcast %10 : vector<1x256xf32> to vector<4x256xf32>
    %c5 = arith.constant 5 : index
    %c0_4 = arith.constant 0 : index
    %12 = vector.load %arg8[%c5, %c0_4] : memref<9x256xf32, #tpu.memory_space<vmem>>, vector<1x256xf32>
    %13 = vector.shape_cast %12 : vector<1x256xf32> to vector<1x256xf32>
    %14 = vector.broadcast %13 : vector<1x256xf32> to vector<4x256xf32>
    %c6 = arith.constant 6 : index
    %c0_5 = arith.constant 0 : index
    %15 = vector.load %arg8[%c6, %c0_5] : memref<9x256xf32, #tpu.memory_space<vmem>>, vector<1x256xf32>
    %16 = vector.shape_cast %15 : vector<1x256xf32> to vector<1x256xf32>
    %17 = vector.broadcast %16 : vector<1x256xf32> to vector<4x256xf32>
    %c7 = arith.constant 7 : index
    %c0_6 = arith.constant 0 : index
    %18 = vector.load %arg8[%c7, %c0_6] : memref<9x256xf32, #tpu.memory_space<vmem>>, vector<1x256xf32>
    %19 = vector.shape_cast %18 : vector<1x256xf32> to vector<1x256xf32>
    %20 = vector.broadcast %19 : vector<1x256xf32> to vector<4x256xf32>
    %c8 = arith.constant 8 : index
    %c0_7 = arith.constant 0 : index
    %21 = vector.load %arg8[%c8, %c0_7] : memref<9x256xf32, #tpu.memory_space<vmem>>, vector<1x256xf32>
    %22 = vector.shape_cast %21 : vector<1x256xf32> to vector<1x256xf32>
    %23 = vector.broadcast %22 : vector<1x256xf32> to vector<4x256xf32>
    %cst = arith.constant 0.000000e+00 : f32
    %24 = vector.broadcast %cst : f32 to vector<4x256xf32>
    %c0_8 = arith.constant 0 : index
    %c0_9 = arith.constant 0 : index
    %c0_10 = arith.constant 0 : index
    %25 = vector.load %arg1[%c0_8, %c0_9, %c0_10] : memref<1x4x256xf32, #tpu.memory_space<vmem>>, vector<1x4x256xf32>
    %26 = vector.shape_cast %25 : vector<1x4x256xf32> to vector<4x256xf32>
    %c0_11 = arith.constant 0 : index
    %c0_12 = arith.constant 0 : index
    %27 = vector.load %arg2[%c0_11, %c0_12] : memref<4x40xf32, #tpu.memory_space<vmem>>, vector<4x40xf32>
    %c34_i32 = arith.constant 34 : i32
    %28 = tpu.dynamic_rotate %26 by %c34_i32 dim 1 : vector<4x256xf32>, i32 -> vector<4x256xf32>
    %29 = arith.mulf %28, %2 : vector<4x256xf32>
    %c32_i32 = arith.constant 32 : i32
    %30 = tpu.dynamic_rotate %26 by %c32_i32 dim 1 : vector<4x256xf32>, i32 -> vector<4x256xf32>
    %31 = arith.mulf %30, %5 : vector<4x256xf32>
    %c30_i32 = arith.constant 30 : i32
    %32 = tpu.dynamic_rotate %26 by %c30_i32 dim 1 : vector<4x256xf32>, i32 -> vector<4x256xf32>
    %33 = arith.mulf %32, %8 : vector<4x256xf32>
    %c2_i32 = arith.constant 2 : i32
    %34 = tpu.dynamic_rotate %26 by %c2_i32 dim 1 : vector<4x256xf32>, i32 -> vector<4x256xf32>
    %35 = arith.mulf %34, %11 : vector<4x256xf32>
    %c254_i32 = arith.constant 254 : i32
    %36 = tpu.dynamic_rotate %26 by %c254_i32 dim 1 : vector<4x256xf32>, i32 -> vector<4x256xf32>
    %37 = arith.mulf %36, %14 : vector<4x256xf32>
    %c226_i32 = arith.constant 226 : i32
    %38 = tpu.dynamic_rotate %26 by %c226_i32 dim 1 : vector<4x256xf32>, i32 -> vector<4x256xf32>
    %39 = arith.mulf %38, %17 : vector<4x256xf32>
    %c224_i32 = arith.constant 224 : i32
    %40 = tpu.dynamic_rotate %26 by %c224_i32 dim 1 : vector<4x256xf32>, i32 -> vector<4x256xf32>
    %41 = arith.mulf %40, %20 : vector<4x256xf32>
    %c222_i32 = arith.constant 222 : i32
    %42 = tpu.dynamic_rotate %26 by %c222_i32 dim 1 : vector<4x256xf32>, i32 -> vector<4x256xf32>
    %43 = arith.mulf %42, %23 : vector<4x256xf32>
    %44 = tpu.concatenate %29, %31, %33, %35, %26, %37, %39, %41, %43, %24 in 0 : vector<4x256xf32>, vector<4x256xf32>, vector<4x256xf32>, vector<4x256xf32>, vector<4x256xf32>, vector<4x256xf32>, vector<4x256xf32>, vector<4x256xf32>, vector<4x256xf32>, vector<4x256xf32> -> vector<40x256xf32>
    %cst_13 = arith.constant dense<0.000000e+00> : vector<4x256xf32>
    %45 = tpu.matmul %27, %44, %cst_13 {dimension_numbers = #tpu.dot_dimension_numbers<[1], [0], [0], [1], [0, 0, 1, 1], [], []>} : vector<4x40xf32>, vector<40x256xf32>, vector<4x256xf32> -> vector<4x256xf32>
    %c0_14 = arith.constant 0 : index
    %c0_15 = arith.constant 0 : index
    %46 = vector.load %arg4[%c0_14, %c0_15] : memref<4x1xf32, #tpu.memory_space<vmem>>, vector<4x1xf32>
    %47 = vector.broadcast %46 : vector<4x1xf32> to vector<4x256xf32>
    %48 = arith.addf %45, %47 : vector<4x256xf32>
    %c0_16 = arith.constant 0 : index
    %c0_17 = arith.constant 0 : index
    %49 = vector.load %arg3[%c0_16, %c0_17] : memref<8x40xf32, #tpu.memory_space<vmem>>, vector<8x40xf32>
    %c34_i32_18 = arith.constant 34 : i32
    %50 = tpu.dynamic_rotate %48 by %c34_i32_18 dim 1 : vector<4x256xf32>, i32 -> vector<4x256xf32>
    %51 = arith.mulf %50, %2 : vector<4x256xf32>
    %c32_i32_19 = arith.constant 32 : i32
    %52 = tpu.dynamic_rotate %48 by %c32_i32_19 dim 1 : vector<4x256xf32>, i32 -> vector<4x256xf32>
    %53 = arith.mulf %52, %5 : vector<4x256xf32>
    %c30_i32_20 = arith.constant 30 : i32
    %54 = tpu.dynamic_rotate %48 by %c30_i32_20 dim 1 : vector<4x256xf32>, i32 -> vector<4x256xf32>
    %55 = arith.mulf %54, %8 : vector<4x256xf32>
    %c2_i32_21 = arith.constant 2 : i32
    %56 = tpu.dynamic_rotate %48 by %c2_i32_21 dim 1 : vector<4x256xf32>, i32 -> vector<4x256xf32>
    %57 = arith.mulf %56, %11 : vector<4x256xf32>
    %c254_i32_22 = arith.constant 254 : i32
    %58 = tpu.dynamic_rotate %48 by %c254_i32_22 dim 1 : vector<4x256xf32>, i32 -> vector<4x256xf32>
    %59 = arith.mulf %58, %14 : vector<4x256xf32>
    %c226_i32_23 = arith.constant 226 : i32
    %60 = tpu.dynamic_rotate %48 by %c226_i32_23 dim 1 : vector<4x256xf32>, i32 -> vector<4x256xf32>
    %61 = arith.mulf %60, %17 : vector<4x256xf32>
    %c224_i32_24 = arith.constant 224 : i32
    %62 = tpu.dynamic_rotate %48 by %c224_i32_24 dim 1 : vector<4x256xf32>, i32 -> vector<4x256xf32>
    %63 = arith.mulf %62, %20 : vector<4x256xf32>
    %c222_i32_25 = arith.constant 222 : i32
    %64 = tpu.dynamic_rotate %48 by %c222_i32_25 dim 1 : vector<4x256xf32>, i32 -> vector<4x256xf32>
    %65 = arith.mulf %64, %23 : vector<4x256xf32>
    %66 = tpu.concatenate %51, %53, %55, %57, %48, %59, %61, %63, %65, %24 in 0 : vector<4x256xf32>, vector<4x256xf32>, vector<4x256xf32>, vector<4x256xf32>, vector<4x256xf32>, vector<4x256xf32>, vector<4x256xf32>, vector<4x256xf32>, vector<4x256xf32>, vector<4x256xf32> -> vector<40x256xf32>
    %cst_26 = arith.constant dense<0.000000e+00> : vector<8x256xf32>
    %67 = tpu.matmul %49, %66, %cst_26 {dimension_numbers = #tpu.dot_dimension_numbers<[1], [0], [0], [1], [0, 0, 1, 1], [], []>} : vector<8x40xf32>, vector<40x256xf32>, vector<8x256xf32> -> vector<8x256xf32>
    %c0_27 = arith.constant 0 : index
    %c0_28 = arith.constant 0 : index
    %68 = vector.load %arg5[%c0_27, %c0_28] : memref<8x1xf32, #tpu.memory_space<vmem>>, vector<8x1xf32>
    %69 = vector.broadcast %68 : vector<8x1xf32> to vector<8x256xf32>
    %70 = arith.addf %67, %69 : vector<8x256xf32>
    %cst_29 = arith.constant dense<0.000000e+00> : vector<256xf32>
    %71 = vector.multi_reduction <add>, %70, %cst_29 [0] : vector<8x256xf32> to vector<256xf32>
    %72 = vector.shape_cast %71 : vector<256xf32> to vector<1x256xf32>
    %cst_30 = arith.constant 8.000000e+00 : f32
    %73 = vector.broadcast %cst_30 : f32 to vector<1x256xf32>
    %74 = arith.divf %72, %73 : vector<1x256xf32>
    %75 = vector.broadcast %74 : vector<1x256xf32> to vector<8x256xf32>
    %76 = arith.subf %70, %75 : vector<8x256xf32>
    %77 = arith.mulf %76, %76 : vector<8x256xf32>
    %cst_31 = arith.constant dense<0.000000e+00> : vector<256xf32>
    %78 = vector.multi_reduction <add>, %77, %cst_31 [0] : vector<8x256xf32> to vector<256xf32>
    %79 = vector.shape_cast %78 : vector<256xf32> to vector<1x256xf32>
    %cst_32 = arith.constant 8.000000e+00 : f32
    %80 = vector.broadcast %cst_32 : f32 to vector<1x256xf32>
    %81 = arith.divf %79, %80 : vector<1x256xf32>
    %82 = vector.broadcast %74 : vector<1x256xf32> to vector<8x256xf32>
    %83 = arith.subf %70, %82 : vector<8x256xf32>
    %cst_33 = arith.constant 9.99999974E-6 : f32
    %84 = vector.broadcast %cst_33 : f32 to vector<1x256xf32>
    %85 = arith.addf %81, %84 : vector<1x256xf32>
    %86 = math.rsqrt %85 : vector<1x256xf32>
    %87 = vector.broadcast %86 : vector<1x256xf32> to vector<8x256xf32>
    %88 = arith.mulf %83, %87 : vector<8x256xf32>
    %c0_34 = arith.constant 0 : index
    %c0_35 = arith.constant 0 : index
    %89 = vector.load %arg6[%c0_34, %c0_35] : memref<8x1xf32, #tpu.memory_space<vmem>>, vector<8x1xf32>
    %90 = vector.broadcast %89 : vector<8x1xf32> to vector<8x256xf32>
    %91 = arith.mulf %88, %90 : vector<8x256xf32>
    %c0_36 = arith.constant 0 : index
    %c0_37 = arith.constant 0 : index
    %92 = vector.load %arg7[%c0_36, %c0_37] : memref<8x1xf32, #tpu.memory_space<vmem>>, vector<8x1xf32>
    %93 = vector.broadcast %92 : vector<8x1xf32> to vector<8x256xf32>
    %94 = arith.addf %91, %93 : vector<8x256xf32>
    %c0_38 = arith.constant 0 : index
    %95 = memref.load %arg9[%c0_38] : memref<1xf32, #tpu.memory_space<smem>>
    %cst_39 = arith.constant 0.000000e+00 : f32
    %96 = vector.broadcast %cst_39 : f32 to vector<8x256xf32>
    %97 = arith.cmpf oge, %94, %96 : vector<8x256xf32>
    %98 = vector.broadcast %95 : f32 to vector<8x256xf32>
    %99 = arith.mulf %98, %94 : vector<8x256xf32>
    %100 = arith.select %97, %94, %99 : vector<8x256xi1>, vector<8x256xf32>
    %c0_40 = arith.constant 0 : index
    %c0_41 = arith.constant 0 : index
    %c0_42 = arith.constant 0 : index
    %101 = vector.load %arg10[%c0_40, %c0_41, %c0_42] : memref<1x8x256xf32, #tpu.memory_space<vmem>>, vector<1x8x256xf32>
    %102 = vector.shape_cast %101 : vector<1x8x256xf32> to vector<8x256xf32>
    %103 = vector.shape_cast %100 : vector<8x256xf32> to vector<1x8x256xf32>
    tpu.vector_store %arg10[%c0_40, %c0_41, %c0_42], %103 {strides = array<i32>} : memref<1x8x256xf32, #tpu.memory_space<vmem>>, vector<1x8x256xf32>,
    return
  }
  func.func @transform_0(%arg0: i32) -> (i32, i32, i32) {
    %c0_i32 = arith.constant 0 : i32
    %c0_i32_0 = arith.constant 0 : i32
    %c0_i32_1 = arith.constant 0 : i32
    return %arg0, %c0_i32, %c0_i32_0 : i32, i32, i32
  }
  func.func @transform_1(%arg0: i32) -> (i32, i32) {
    %c0_i32 = arith.constant 0 : i32
    %c0_i32_0 = arith.constant 0 : i32
    %c0_i32_1 = arith.constant 0 : i32
    return %c0_i32, %c0_i32_0 : i32, i32
  }
  func.func @transform_2(%arg0: i32) -> (i32, i32) {
    %c0_i32 = arith.constant 0 : i32
    %c0_i32_0 = arith.constant 0 : i32
    %c0_i32_1 = arith.constant 0 : i32
    return %c0_i32, %c0_i32_0 : i32, i32
  }
  func.func @transform_3(%arg0: i32) -> (i32, i32) {
    %c0_i32 = arith.constant 0 : i32
    %c0_i32_0 = arith.constant 0 : i32
    %c0_i32_1 = arith.constant 0 : i32
    return %c0_i32, %c0_i32_0 : i32, i32
  }
  func.func @transform_4(%arg0: i32) -> (i32, i32) {
    %c0_i32 = arith.constant 0 : i32
    %c0_i32_0 = arith.constant 0 : i32
    %c0_i32_1 = arith.constant 0 : i32
    return %c0_i32, %c0_i32_0 : i32, i32
  }
  func.func @transform_5(%arg0: i32) -> (i32, i32) {
    %c0_i32 = arith.constant 0 : i32
    %c0_i32_0 = arith.constant 0 : i32
    %c0_i32_1 = arith.constant 0 : i32
    return %c0_i32, %c0_i32_0 : i32, i32
  }
  func.func @transform_6(%arg0: i32) -> (i32, i32) {
    %c0_i32 = arith.constant 0 : i32
    %c0_i32_0 = arith.constant 0 : i32
    %c0_i32_1 = arith.constant 0 : i32
    return %c0_i32, %c0_i32_0 : i32, i32
  }
  func.func @transform_7(%arg0: i32) -> (i32, i32) {
    %c0_i32 = arith.constant 0 : i32
    %c0_i32_0 = arith.constant 0 : i32
    %c0_i32_1 = arith.constant 0 : i32
    return %c0_i32, %c0_i32_0 : i32, i32
  }
  func.func @transform_8(%arg0: i32) -> i32 {
    %c0_i32 = arith.constant 0 : i32
    %c0_i32_0 = arith.constant 0 : i32
    return %c0_i32 : i32
  }
  func.func @transform_9(%arg0: i32) -> (i32, i32, i32) {
    %c0_i32 = arith.constant 0 : i32
    %c0_i32_0 = arith.constant 0 : i32
    %c0_i32_1 = arith.constant 0 : i32
    return %arg0, %c0_i32, %c0_i32_0 : i32, i32, i32
  }
}

</mosaic_0001>

<bundles_post_ra>
// kernel: conv_block_forward.1
= control target key start
LH: loop header
LB: loop body
LE: loop exit
PB: predicated region body
PF: predicated region fallthrough
CT: control target
= control target key end

     0   :  { %s1069_s11 = smov 0   ;;  %s1390_s0 = inlined_call_operand.vmem [shape: f32[2,4,256], index: 0, kind: input, shape index: {}]   ;;  %s1391_s1 = inlined_call_operand.vmem [shape: f32[4,40], index: 1, kind: input, shape index: {}]   ;;  %s1392_s2 = inlined_call_operand.vmem [shape: f32[8,40], index: 2, kind: input, shape index: {}]   ;;  %s1393_s3 = inlined_call_operand.vmem [shape: f32[4,1], index: 3, kind: input, shape index: {}]   ;;  %s1394_s4 = inlined_call_operand.vmem [shape: f32[8,1], index: 4, kind: input, shape index: {}]   ;;  %s1395_s5 = inlined_call_operand.vmem [shape: f32[8,1], index: 5, kind: input, shape index: {}]   ;;  %s1396_s6 = inlined_call_operand.vmem [shape: f32[8,1], index: 6, kind: input, shape index: {}]   ;;  %s1397_s7 = inlined_call_operand.vmem [shape: f32[9,256], index: 7, kind: input, shape index: {}]   ;;  %s1398_s8 = inlined_call_operand.<no memory space> [shape: f32[1], index: 8, kind: input, shape index: {}]   ;;  %s1399_s9 = inlined_call_operand.vmem [shape: f32[2,8,256], index: 9, kind: output, shape index: {}]  }
   0x1   :  { %14 = sst [smem:[#allocation2]] %s1398_s8 }
   0x2 LB: > { %s931_s12 = sadd.s32 4294967295, %s1004_s11   ;;  %p935_p0 = scmp.ge.s32.totalorder %s1004_s11, 1  ;;  %s1004_s11 = sphi %s1069_s11, %s20_s11  }
   0x3   : > { %p288_p1 = scmp.lt.s32.totalorder %s1004_s11, 3 }
   0x5   : > { %p289_p2 = pnand %p935_p0, %p288_p1 }
   0x6   : > { %p324_p3 = scmp.lt.s32.totalorder (!%p289_p2), %s931_s12, 1  ;;  %s1006_s16 = smov (!%p289_p2), 2   ;;  %v1012_v2 = vmov (!%p289_p2), 0.0   ;;  %v1014_v3 = vmov (!%p289_p2), 0   ;;  %v551_v4 = vld [vmem:[%s1393_s3] sm:$0xf] (!%p289_p2)  ;;  %v336_v5 = vlaneseq (!%p289_p2) }
   0x7   : > { %292 = sbr.rel (%p289_p2) target bundleno = 808 (0x328), region = 56  ;;  %s1007_s17 = smov (!%p289_p2), 32   ;;  %625 = vmatprep.mubr.f32.mxu0 (!%p289_p2), %v1012_v2  ;;  %804 = vmatprep.mubr.f32.mxu1 (!%p289_p2), %v1012_v2  ;;  %v942_v12 = vld [vmem:[%s1397_s7 + $0x3] ss:$8 sm:$0x3] (!%p289_p2)  ;;  %vm540_vm4 = vcmask (!%p289_p2), 1043456  }
   0x8   : > { %s1008_s18 = smov (!%p289_p2), 34   ;;  %s1009_s19 = smov (!%p289_p2), 30   ;;  %991 = vset.pattern.permute.xlu0 (!%p289_p2), %v1014_v3  ;;  %992 = vset.pattern.permute.xlu1 (!%p289_p2), %v1014_v3  ;;  %v337_v6 = vshrl.u32 (!%p289_p2), %v336_v5, 7  ;;  %v1124_v7 = vand.u32 (!%p289_p2), 127, %v336_v5  ;;  %vm557_vm9 = vcmask (!%p289_p2), 326656  }
   0x9   : > { %s1010_s20 = smov (!%p289_p2), 126   ;;  %s1011_s21 = smov (!%p289_p2), 96   ;;  %v940_v13 = vld [vmem:[%s1397_s7 + $0x1] ss:$8 sm:$0x3] (!%p289_p2) }
   0xa   : > { %s1013_s22 = smov (!%p289_p2), 98   ;;  %s1015_s23 = smov (!%p289_p2), 94   ;;  %v1126_v10 = vsub.s32 (!%p289_p2), 0, %v337_v6  ;;  %v1128_v11 = vsub.s32 (!%p289_p2), 1, %v337_v6  ;;  %vm475_vm0 = vcmp.lt.s32.totalorder (!%p289_p2), %v1124_v7, 2  ;;  %vm457_vm1 = vcmp.lt.s32.totalorder (!%p289_p2), %v1124_v7, 32 }
   0xb   : > { %v334_v18 = vld [vmem:[%s1397_s7] ss:$8 sm:$0x3] (!%p289_p2)  ;;  %v941_v23 = vld [vmem:[%s1397_s7 + $0x2] ss:$8 sm:$0x3] (!%p289_p2) }
   0xc   : > { %v1138_v16 = vrot.slane (!%p289_p2), %v942_v12, %v1126_v10  ;;  %v1141_v17 = vrot.slane (!%p289_p2), %v942_v12, %v1128_v11  ;;  %v1152_v21 = vrot.slane (!%p289_p2), %v940_v13, %v1126_v10  ;;  %v1155_v22 = vrot.slane (!%p289_p2), %v940_v13, %v1128_v11  ;;  %v943_v42 = vld [vmem:[%s1397_s7 + $0x5] ss:$8 sm:$0x3] (!%p289_p2)  ;;  %v945_v53 = vld [vmem:[%s1397_s7 + $0x7] ss:$8 sm:$0x3] (!%p289_p2) }
   0xd   : > { %v1161_v24 = vrot.slane (!%p289_p2), %v334_v18, %v1126_v10  ;;  %v1164_v25 = vrot.slane (!%p289_p2), %v334_v18, %v1128_v11  ;;  %vm448_vm2 = vcmp.lt.s32.totalorder (!%p289_p2), %v1124_v7, 34  ;;  %vm466_vm3 = vcmp.lt.s32.totalorder (!%p289_p2), %v1124_v7, 30 }
   0xe   : > { %s1401_s12 = smov (!%p324_p3, %s931_s12), 1  ;;  %v1177_v34 = vrot.slane %v941_v23, %v1126_v10  ;;  %v1180_v35 = vrot.slane %v941_v23, %v1128_v11  ;;  %vm484_vm5 = vcmp.lt.s32.totalorder %v1124_v7, 126  ;;  %v1199_v51 = vrot.slane %v943_v42, %v1126_v10 }
   0xf   : > { %s955_s8 = sshll.u32 %s1401_s12, 3  ;;  %v1202_v52 = vrot.slane %v943_v42, %v1128_v11  ;;  %v1216_v2 = vrot.slane %v945_v53, %v1126_v10  ;;  %v1219_v3 = vrot.slane %v945_v53, %v1128_v11  ;;  %vm502_vm6 = vcmp.lt.s32.totalorder %v1124_v7, 96  ;;  %s956_s13 = sshll.u32 %s1401_s12, 4 }
  0x10   : > { %s328_s15 = scalar_lea.vmem %s1390_s0, %s955_s8  ;;  %vm493_vm7 = vcmp.lt.s32.totalorder %v1124_v7, 98  ;;  %vm511_vm8 = vcmp.lt.s32.totalorder %v1124_v7, 94  ;;  %s333_s24 = scalar_lea.vmem %s1399_s9, %s956_s13 }
  0x11   : > { %v1083_v0 = vld [vmem:[%s328_s15] sm:$0xff] }
  0x12   : > { %471 = vrot.lane.b32.xlu1 %v1083_v0, %s1006_s16  ;;  %453 = vrot.lane.b32.xlu0 %v1083_v0, %s1007_s17  ;;  %v1091_v1 = vcombine.high %v1083_v0, %v1083_v0 }
  0x16   : > { %442 = vrot.lane.b32.xlu0 %v1083_v0, %s1008_s18  ;;  %473 = vrot.lane.b32.xlu1 %v1091_v1, %s1006_s16 }
  0x1a   : > { %444 = vrot.lane.b32.xlu1 %v1091_v1, %s1008_s18  ;;  %455 = vrot.lane.b32.xlu0 %v1091_v1, %s1007_s17 }
  0x1e   : > { %464 = vrot.lane.b32.xlu1 %v1091_v1, %s1009_s19  ;;  %462 = vrot.lane.b32.xlu0 %v1083_v0, %s1009_s19 }
  0x22   : > { %482 = vrot.lane.b32.xlu1 %v1091_v1, %s1010_s20  ;;  %480 = vrot.lane.b32.xlu0 %v1083_v0, %s1010_s20 }
  0x26   : > { %500 = vrot.lane.b32.xlu1 %v1091_v1, %s1011_s21  ;;  %498 = vrot.lane.b32.xlu0 %v1083_v0, %s1011_s21 }
  0x2a   : > { %491 = vrot.lane.b32.xlu1 %v1091_v1, %s1013_s22  ;;  %489 = vrot.lane.b32.xlu0 %v1083_v0, %s1013_s22 }
  0x2e   : > { %509 = vrot.lane.b32.xlu1 %v1091_v1, %s1015_s23  ;;  %507 = vrot.lane.b32.xlu0 %v1083_v0, %s1015_s23 }
  0x32   : > { %554 = vperm.xlu0 %991, %v551_v4   ;;  %v944_v4 = vld [vmem:[%s1397_s7 + $0x6] ss:$8 sm:$0x3] }
  0x84   : > { %v472_v8 = vpop.permute.xlu1 %471  ;;  %v454_v9 = vpop.permute.xlu0 %453 }
  0x88   : > { %v443_v14 = vpop.permute.xlu0 %442  ;;  %v474_v15 = vpop.permute.xlu1 %473 }
  0x89   : > { %v476_v19 = vsel %vm475_vm0, %v472_v8, %v474_v15  ;;  %v477_v20 = vsel %vm475_vm0, %v474_v15, %v472_v8 }
  0x8a   : > { %v478_v28 = vmul.f32 %v477_v20, %v1138_v16  ;;  %v479_v29 = vmul.f32 %v476_v19, %v1141_v17  ;;  %v1237_v19 = vrot.slane %v944_v4, %v1128_v11  ;;  %v946_v20 = vld [vmem:[%s1397_s7 + $0x10] ss:$8 sm:$0x3] }
  0x8c   : > { %v445_v26 = vpop.permute.xlu1 %444  ;;  %v456_v27 = vpop.permute.xlu0 %455  ;;  %v524_v43 = vrot.slane %v478_v28, 4  ;;  %v525_v44 = vrot.slane %v479_v29, 4 }
  0x8d   : > { %v458_v30 = vsel %vm457_vm1, %v454_v9, %v456_v27  ;;  %v459_v31 = vsel %vm457_vm1, %v456_v27, %v454_v9  ;;  %v449_v36 = vsel %vm448_vm2, %v443_v14, %v445_v26  ;;  %v450_v37 = vsel %vm448_vm2, %v445_v26, %v443_v14 }
  0x8e   : > { %v460_v32 = vmul.f32 %v459_v31, %v1152_v21  ;;  %v461_v33 = vmul.f32 %v458_v30, %v1155_v22  ;;  %v451_v47 = vmul.f32 %v450_v37, %v1161_v24  ;;  %v452_v48 = vmul.f32 %v449_v36, %v1164_v25 }
  0x8f   : > { %v1232_v14 = vrot.slane %v944_v4, %v1126_v10  ;;  %v1248_v31 = vrot.slane %v946_v20, %v1128_v11 }
  0x90   : > { %v518_v38 = vrot.slane %v460_v32, 4  ;;  %v519_v39 = vrot.slane %v461_v33, 4  ;;  %v465_v40 = vpop.permute.xlu1 %464  ;;  %v463_v41 = vpop.permute.xlu0 %462 }
  0x91   : > { %v467_v45 = vsel %vm466_vm3, %v463_v41, %v465_v40  ;;  %v468_v46 = vsel %vm466_vm3, %v465_v40, %v463_v41 }
  0x92   : > { %v469_v49 = vmul.f32 %v468_v46, %v1177_v34  ;;  %v470_v50 = vmul.f32 %v467_v45, %v1180_v35  ;;  %v542_v56 = vsel %vm540_vm4, %v452_v48, %v519_v39  ;;  %v541_v58 = vsel %vm540_vm4, %v451_v47, %v518_v38 }
  0x93   : > { %v1254_v38 = vrot.slane %v946_v20, %v1126_v10 }
  0x94   : > { %v483_v54 = vpop.permute.xlu1 %482  ;;  %v481_v55 = vpop.permute.xlu0 %480  ;;  %v544_v57 = vsel %vm540_vm4, %v470_v50, %v525_v44  ;;  %v543_v59 = vsel %vm540_vm4, %v469_v49, %v524_v43 }
  0x95   : > { %v485_v60 = vsel %vm484_vm5, %v481_v55, %v483_v54  ;;  %v486_v61 = vsel %vm484_vm5, %v483_v54, %v481_v55  ;;  %v957_v62 = vpack.c.bf16 %v544_v57, %v542_v56  ;;  %v959_v63 = vpack.c.bf16 %v543_v59, %v541_v58  ;;  %v731_v55 = vld [vmem:[%s1394_s4] sm:$0xff] }
  0x96   : > { %v487_v5 = vmul.f32 %v485_v60, %v1199_v51  ;;  %v488_v6 = vmul.f32 %v486_v61, %v1202_v52  ;;  %v858_v56 = vld [vmem:[%s1396_s6] sm:$0xff] }
  0x97   : > { %958 = vmatprep.subr.bf16.mxu0 %v957_v62  ;;  %v850_v57 = vld [vmem:[%s1395_s5] sm:$0xff] }
  0x98   : > { %v501_v8 = vpop.permute.xlu1 %500  ;;  %960 = vmatpush1.bf16.msra.mxu0 %v959_v63  ;;  %v499_v9 = vpop.permute.xlu0 %498  ;;  %v530_v23 = vrot.slane %v487_v5, 4  ;;  %v531_v26 = vrot.slane %v488_v6, 4 }
  0x99   : > { %v503_v12 = vsel %vm502_vm6, %v499_v9, %v501_v8  ;;  %v504_v13 = vsel %vm502_vm6, %v501_v8, %v499_v9 }
  0x9a   : > { %v505_v15 = vmul.f32 %v503_v12, %v1216_v2  ;;  %v506_v18 = vmul.f32 %v504_v13, %v1219_v3  ;;  %v546_v40 = vsel %vm540_vm4, %v1091_v1, %v531_v26  ;;  %v545_v11 = vsel %vm540_vm4, %v1083_v0, %v530_v23  ;;  %v438_v0 = vld [vmem:[%s1391_s1] sm:$0xf] }
  0x9c   : > { %v492_v27 = vpop.permute.xlu1 %491  ;;  %v490_v28 = vpop.permute.xlu0 %489  ;;  %v536_v32 = vrot.slane %v505_v15, 4  ;;  %v537_v33 = vrot.slane %v506_v18, 4 }
  0x9d   : > { %v494_v29 = vsel %vm493_vm7, %v490_v28, %v492_v27  ;;  %v495_v30 = vsel %vm493_vm7, %v492_v27, %v490_v28 }
  0x9e   : > { %v496_v36 = vmul.f32 %v494_v29, %v1232_v14  ;;  %v497_v37 = vmul.f32 %v495_v30, %v1237_v19 }
  0xa0   : > { %v510_v39 = vpop.permute.xlu1 %509  ;;  %v548_v41 = vsel %vm540_vm4, %v497_v37, %v537_v33  ;;  %v508_v42 = vpop.permute.xlu0 %507  ;;  %v547_v43 = vsel %vm540_vm4, %v496_v36, %v536_v32 }
  0xa1   : > { %v961_v44 = vpack.c.bf16 %v548_v41, %v546_v40  ;;  %v512_v45 = vsel %vm511_vm8, %v508_v42, %v510_v39  ;;  %v513_v10 = vsel %vm511_vm8, %v510_v39, %v508_v42  ;;  %v963_v46 = vpack.c.bf16 %v547_v43, %v545_v11 }
  0xa2   : > { %v515_v47 = vmul.f32 %v513_v10, %v1248_v31  ;;  %v514_v1 = vmul.f32 %v512_v45, %v1254_v38 }
  0xa3   : > { %962 = vmatprep.subr.bf16.mxu0 %v961_v44 }
  0xa4   : > { %964 = vmatpush1.bf16.msra.mxu0 %v963_v46 }
  0xa5   : > { %947 = vmatprep.subr.msk.mxu0 %vm540_vm4, %v515_v47 }
  0xa8   : > { %948 = vmatpush1.msk.msra.mxu0 %vm540_vm4, %v514_v1 }
  0xa9   : > { %949 = vmatmul.mubr.msk.f32.vlgmr.msra.gmra.mrb[0].mxu0 %vm557_vm9, %v438_v0 }
  0xb1   : > { %v555_v48 = vpop.permute.xlu0 %554 }
 0x17c   : > { %v627_v49 = vpop.f32.mrb[0].mxu0 }
 0x17d   : > { %v1274_v50 = vadd.f32 %v627_v49, %v555_v48  ;;  %v629_v53 = vpop.f32.mrb[1].mxu0 }
 0x17e   : > { %v1280_v54 = vadd.f32 %v629_v53, %v555_v48 }
 0x17f   : > { %657 = vrot.lane.b32.xlu0 %v1274_v50, %s1006_s16  ;;  %641 = vrot.lane.b32.xlu1 %v1274_v50, %s1007_s17 }
 0x183   : > { %633 = vrot.lane.b32.xlu0 %v1274_v50, %s1008_s18  ;;  %643 = vrot.lane.b32.xlu1 %v1280_v54, %s1007_s17 }
 0x187   : > { %649 = vrot.lane.b32.xlu0 %v1274_v50, %s1009_s19  ;;  %659 = vrot.lane.b32.xlu1 %v1280_v54, %s1006_s16 }
 0x18b   : > { %665 = vrot.lane.b32.xlu0 %v1274_v50, %s1010_s20  ;;  %635 = vrot.lane.b32.xlu1 %v1280_v54, %s1008_s18 }
 0x18f   : > { %681 = vrot.lane.b32.xlu0 %v1274_v50, %s1011_s21  ;;  %651 = vrot.lane.b32.xlu1 %v1280_v54, %s1009_s19 }
 0x193   : > { %673 = vrot.lane.b32.xlu0 %v1274_v50, %s1013_s22  ;;  %667 = vrot.lane.b32.xlu1 %v1280_v54, %s1010_s20 }
 0x197   : > { %689 = vrot.lane.b32.xlu0 %v1274_v50, %s1015_s23  ;;  %683 = vrot.lane.b32.xlu1 %v1280_v54, %s1011_s21 }
 0x19b   : > { %734 = vperm.xlu0 %991, %v731_v55   ;;  %675 = vrot.lane.b32.xlu1 %v1280_v54, %s1013_s22 }
 0x19f   : > { %861 = vperm.xlu0 %991, %v858_v56   ;;  %691 = vrot.lane.b32.xlu1 %v1280_v54, %s1015_s23  ;;  %s866_s23 = sld [smem:[#allocation2]] }
 0x1a3   : > { %853 = vperm.xlu1 %992, %v850_v57  }
 0x1f1   : > { %v658_v58 = vpop.permute.xlu0 %657  ;;  %v642_v59 = vpop.permute.xlu1 %641 }
 0x1f5   : > { %v634_v60 = vpop.permute.xlu0 %633  ;;  %v644_v61 = vpop.permute.xlu1 %643 }
 0x1f6   : > { %v645_v4 = vsel %vm457_vm1, %v642_v59, %v644_v61  ;;  %v646_v5 = vsel %vm457_vm1, %v644_v61, %v642_v59 }
 0x1f7   : > { %v647_v12 = vmul.f32 %v646_v5, %v1152_v21  ;;  %v648_v13 = vmul.f32 %v645_v4, %v1155_v22 }
 0x1f9   : > { %v650_v62 = vpop.permute.xlu0 %649  ;;  %v660_v63 = vpop.permute.xlu1 %659  ;;  %v699_v30 = vrot.slane %v647_v12, 4  ;;  %v700_v21 = vrot.slane %v648_v13, 4 }
 0x1fa   : > { %v661_v6 = vsel %vm475_vm0, %v658_v58, %v660_v63  ;;  %v662_v8 = vsel %vm475_vm0, %v660_v63, %v658_v58 }
 0x1fb   : > { %v663_v20 = vmul.f32 %v662_v8, %v1138_v16  ;;  %v664_v23 = vmul.f32 %v661_v6, %v1141_v17 }
 0x1fd   : > { %v636_v9 = vpop.permute.xlu1 %635  ;;  %v666_v26 = vpop.permute.xlu0 %665  ;;  %v705_v33 = vrot.slane %v663_v20, 4  ;;  %v706_v36 = vrot.slane %v664_v23, 4 }
 0x1fe   : > { %v637_v15 = vsel %vm448_vm2, %v634_v60, %v636_v9  ;;  %v638_v18 = vsel %vm448_vm2, %v636_v9, %v634_v60 }
 0x1ff   : > { %v639_v27 = vmul.f32 %v638_v18, %v1161_v24  ;;  %v640_v28 = vmul.f32 %v637_v15, %v1164_v25 }
 0x201   : > { %v652_v29 = vpop.permute.xlu1 %651  ;;  %v682_v37 = vpop.permute.xlu0 %681  ;;  %v722_v24 = vsel %vm540_vm4, %v640_v28, %v700_v21  ;;  %v721_v40 = vsel %vm540_vm4, %v639_v27, %v699_v30 }
 0x202   : > { %v653_v22 = vsel %vm466_vm3, %v650_v62, %v652_v29  ;;  %v654_v32 = vsel %vm466_vm3, %v652_v29, %v650_v62 }
 0x203   : > { %v655_v16 = vmul.f32 %v654_v32, %v1177_v34  ;;  %v656_v17 = vmul.f32 %v653_v22, %v1180_v35 }
 0x205   : > { %v668_v39 = vpop.permute.xlu1 %667  ;;  %v724_v25 = vsel %vm540_vm4, %v656_v17, %v706_v36  ;;  %v723_v41 = vsel %vm540_vm4, %v655_v16, %v705_v33  ;;  %v674_v47 = vpop.permute.xlu0 %673 }
 0x206   : > { %v669_v42 = vsel %vm484_vm5, %v666_v26, %v668_v39  ;;  %v670_v11 = vsel %vm484_vm5, %v668_v39, %v666_v26  ;;  %v965_v43 = vpack.c.bf16 %v724_v25, %v722_v24  ;;  %v967_v34 = vpack.c.bf16 %v723_v41, %v721_v40 }
 0x207   : > { %v671_v35 = vmul.f32 %v669_v42, %v1199_v51  ;;  %v672_v44 = vmul.f32 %v670_v11, %v1202_v52 }
 0x208   : > { %966 = vmatprep.subr.bf16.mxu1 %v965_v43 }
 0x209   : > { %968 = vmatpush1.bf16.msra.mxu1 %v967_v34  ;;  %v684_v45 = vpop.permute.xlu1 %683  ;;  %v711_v48 = vrot.slane %v671_v35, 4  ;;  %v712_v49 = vrot.slane %v672_v44, 4  ;;  %v690_v59 = vpop.permute.xlu0 %689 }
 0x20a   : > { %v685_v10 = vsel %vm502_vm6, %v682_v37, %v684_v45  ;;  %v686_v46 = vsel %vm502_vm6, %v684_v45, %v682_v37 }
 0x20b   : > { %v687_v1 = vmul.f32 %v685_v10, %v1216_v2  ;;  %v688_v0 = vmul.f32 %v686_v46, %v1219_v3  ;;  %v726_v2 = vsel %vm540_vm4, %v1280_v54, %v712_v49  ;;  %v725_v61 = vsel %vm540_vm4, %v1274_v50, %v711_v48  ;;  %v632_v50 = vld [vmem:[%s1392_s2] sm:$0xff] }
 0x20d   : > { %v676_v53 = vpop.permute.xlu1 %675  ;;  %v717_v55 = vrot.slane %v687_v1, 4  ;;  %v718_v56 = vrot.slane %v688_v0, 4 }
 0x20e   : > { %v677_v51 = vsel %vm493_vm7, %v674_v47, %v676_v53  ;;  %v678_v52 = vsel %vm493_vm7, %v676_v53, %v674_v47 }
 0x20f   : > { %v679_v57 = vmul.f32 %v677_v51, %v1232_v14  ;;  %v680_v58 = vmul.f32 %v678_v52, %v1237_v19  ;;  %v869_v52 = vstv %s866_s23 }
 0x211   : > { %v692_v60 = vpop.permute.xlu1 %691  ;;  %v728_v3 = vsel %vm540_vm4, %v680_v58, %v718_v56  ;;  %v727_v62 = vsel %vm540_vm4, %v679_v57, %v717_v55 }
 0x212   : > { %v694_v63 = vsel %vm511_vm8, %v692_v60, %v690_v59  ;;  %v969_v4 = vpack.c.bf16 %v728_v3, %v726_v2  ;;  %v971_v5 = vpack.c.bf16 %v727_v62, %v725_v61  ;;  %v693_v19 = vsel %vm511_vm8, %v690_v59, %v692_v60 }
 0x213   : > { %v696_v14 = vmul.f32 %v694_v63, %v1248_v31  ;;  %v695_v54 = vmul.f32 %v693_v19, %v1254_v38 }
 0x214   : > { %970 = vmatprep.subr.bf16.mxu1 %v969_v4 }
 0x215   : > { %972 = vmatpush1.bf16.msra.mxu1 %v971_v5 }
 0x216   : > { %950 = vmatprep.subr.msk.mxu1 %vm540_vm4, %v696_v14 }
 0x219   : > { %951 = vmatpush1.msk.msra.mxu1 %vm540_vm4, %v695_v54 }
 0x21a   : > { %952 = vmatmul.mubr.msk.f32.vlgmr.msra.gmra.mrb[0].mxu1 %vm557_vm9, %v632_v50  ;;  %v735_v6 = vpop.permute.xlu0 %734 }
 0x21e   : > { %v862_v51 = vpop.permute.xlu0 %861 }
 0x222   : > { %v854_v1 = vpop.permute.xlu1 %853 }
 0x2ed   : > { %v806_v8 = vpop.f32.mrb[0].mxu1 }
 0x2ee   : > { %v807_v31 = vadd.f32 %v806_v8, %v735_v6  ;;  %v808_v9 = vpop.f32.mrb[1].mxu1 }
 0x2ef   : > { %v809_v7 = vadd.f32 %v808_v9, %v735_v6 }
 0x2f0   : > { %v811_v12 = vrot.slane %v807_v31, 4 }
 0x2f1   : > { %v817_v13 = vrot.slane %v809_v7, 4 }
 0x2f2   : > { %v812_v15 = vadd.f32 %v811_v12, %v807_v31 }
 0x2f3   : > { %v818_v18 = vadd.f32 %v817_v13, %v809_v7 }
 0x2f4   : > { %v813_v20 = vrot.slane %v812_v15, 2 }
 0x2f5   : > { %v819_v23 = vrot.slane %v818_v18, 2 }
 0x2f6   : > { %v814_v38 = vadd.f32 %v813_v20, %v812_v15 }
 0x2f7   : > { %v820_v26 = vadd.f32 %v819_v23, %v818_v18 }
 0x2f8   : > { %v815_v27 = vrot.slane %v814_v38, 1 }
 0x2f9   : > { %v821_v28 = vrot.slane %v820_v26, 1 }
 0x2fa   : > { %v816_v29 = vadd.f32 %v815_v27, %v814_v38 }
 0x2fb   : > { %v822_v30 = vadd.f32 %v821_v28, %v820_v26 }
 0x2fc   : > { %v824_v21 = vmul.f32 0.125, %v816_v29 }
 0x2fd   : > { %v825_v22 = vmul.f32 0.125, %v822_v30 }
 0x2fe   : > { %v826_v32 = vsub.f32 %v807_v31, %v824_v21 }
 0x2ff   : > { %v827_v33 = vsub.f32 %v809_v7, %v825_v22 }
 0x300   : > { %v828_v36 = vmul.f32 %v826_v32, %v826_v32 }
 0x301   : > { %v829_v16 = vmul.f32 %v827_v33, %v827_v33 }
 0x302   : > { %v830_v17 = vrot.slane %v828_v36, 4 }
 0x303   : > { %v836_v37 = vrot.slane %v829_v16, 4 }
 0x304   : > { %v831_v39 = vadd.f32 %v830_v17, %v828_v36 }
 0x305   : > { %v837_v24 = vadd.f32 %v836_v37, %v829_v16 }
 0x306   : > { %v832_v25 = vrot.slane %v831_v39, 2 }
 0x307   : > { %v838_v40 = vrot.slane %v837_v24, 2 }
 0x308   : > { %v833_v41 = vadd.f32 %v832_v25, %v831_v39 }
 0x309   : > { %v839_v42 = vadd.f32 %v838_v40, %v837_v24 }
 0x30a   : > { %v834_v11 = vrot.slane %v833_v41, 1 }
 0x30b   : > { %v840_v43 = vrot.slane %v839_v42, 1 }
 0x30c   : > { %v835_v34 = vadd.f32 %v834_v11, %v833_v41 }
 0x30d   : > { %v841_v35 = vadd.f32 %v840_v43, %v839_v42 }
 0x30e   : > { %v842_v44 = vmul.f32 0.125, %v835_v34 }
 0x30f   : > { %v843_v45 = vmul.f32 0.125, %v841_v35 }
 0x310   : > { %v844_v10 = vadd.f32 1e-05, %v842_v44 }
 0x311   : > { %v845_v46 = vadd.f32 1e-05, %v843_v45 }
 0x312   : > { %994 = vrsqrt.f32 %v844_v10 }
 0x313   : > { %996 = vrsqrt.f32 %v845_v46 }
 0x31c   : > { %v995_v47 = vpop.eup %994 }
 0x31d   : > { %v997_v0 = vpop.eup %996  ;;  %v848_v48 = vmul.f32 %v995_v47, %v826_v32 }
 0x31e   : > { %v849_v49 = vmul.f32 %v997_v0, %v827_v33 }
 0x31f   : > { %v856_v53 = vmul.f32 %v854_v1, %v848_v48 }
 0x320   : > { %v857_v55 = vmul.f32 %v854_v1, %v849_v49 }
 0x321   : > { %v864_v56 = vadd.f32 %v862_v51, %v856_v53 }
 0x322   : > { %v865_v57 = vadd.f32 %v862_v51, %v857_v55 }
 0x323   : > { %vm867_vm10 = vcmp.ge.f32.partialorder %v864_v56, 0.0  ;;  %v870_v58 = vmul.f32 %v869_v52, %v864_v56 }
 0x324   : > { %vm868_vm11 = vcmp.ge.f32.partialorder %v865_v57, 0.0  ;;  %v871_v59 = vmul.f32 %v869_v52, %v865_v57 }
 0x325   : > { %v872_v60 = vsel %vm867_vm10, %v864_v56, %v870_v58 }
 0x326   : > { %v873_v2 = vsel %vm868_vm11, %v865_v57, %v871_v59  ;;  %874 = vst [vmem:[%s333_s24] sm:$0xff] %v872_v60 }
 0x327   : > { %875 = vst [vmem:[%s333_s24 + $0x8] sm:$0xff] %v873_v2 }
 0x328 PF: > { %s20_s11 = sadd.s32 1, %s1004_s11  }
 0x329   : > { %p17_p4 = scmp.ge.s32.totalorder %s20_s11, 4  }
 0x32b   :  { %19 = sbr.rel (!%p17_p4) target bundleno = 2 (0x2), region = 93 }

</bundles_post_ra>
